<compile_context>
chip_gen: v7x
topology: tpu7x:2x2x1
jax: 0.10.0
libtpu: 0.0.40
codegen_flags: <defaults>
</compile_context>

<pallas_src>
import jax
import jax.numpy as jnp
from jax.experimental import pallas as pl
from jax.experimental.pallas import tpu as pltpu


def _linear_kernel(x_ref, w_ref, b_ref, o_ref):
    # x: (TB, IN), w: (IN, OUT) [already transposed in wrapper], b: (1, OUT).
    # Native [M,K]x[K,N] MXU contraction with f32 accumulation.
    acc = jnp.dot(x_ref[...], w_ref[...], preferred_element_type=jnp.float32)
    # Fused bias add in the epilogue (kernel is latency-bound; this is free).
    o_ref[...] = (acc + b_ref[...]).astype(o_ref.dtype)


def linear_pallas(x, weight, bias, *, batch_tile=2048):
    """Forward of nn.Linear(IN, OUT): y = x @ weight.T + bias.

    x: (B, IN), weight: (OUT, IN) [PyTorch layout], bias: (OUT,).
    """
    B, IN = x.shape
    OUT = weight.shape[0]

    # One-time wrapper transpose (~800 B constant, usually constant-folded):
    # gives the kernel the MXU-native [K, N] RHS.
    w_t = weight.T                     # (IN, OUT)
    b2d = bias.reshape(1, OUT)         # broadcastable row

    cost = pl.CostEstimate(
        flops=2 * B * IN * OUT,
        transcendentals=0,
        bytes_accessed=4 * (B * IN + IN * OUT + B * OUT + OUT),
    )

    if B > batch_tile:
        # Large-batch path: tile the batch dim with a cdiv grid; pad the
        # ragged tail in the wrapper so every tile is full.  IN / OUT stay
        # full extent (they are < 128, so they must equal the array dims).
        nb = pl.cdiv(B, batch_tile)
        b_padded = nb * batch_tile
        x_in = x if b_padded == B else jnp.pad(x, ((0, b_padded - B), (0, 0)))

        out = pl.pallas_call(
            _linear_kernel,
            out_shape=jax.ShapeDtypeStruct((b_padded, OUT), x.dtype),
            grid=(nb,),
            in_specs=[
                pl.BlockSpec((batch_tile, IN), lambda i: (i, 0)),
                pl.BlockSpec((IN, OUT), lambda i: (0, 0)),
                pl.BlockSpec((1, OUT), lambda i: (0, 0)),
            ],
            out_specs=pl.BlockSpec((batch_tile, OUT), lambda i: (i, 0)),
            compiler_params=pltpu.CompilerParams(
                dimension_semantics=("parallel",)
            ),
            cost_estimate=cost,
        )(x_in, w_t, b2d)
        return out[:B]

    # Small-batch path (the test shape): no grid => no software pipeline.
    # Whole arrays are placed directly in VMEM and the body runs once.
    return pl.pallas_call(
        _linear_kernel,
        out_shape=jax.ShapeDtypeStruct((B, OUT), x.dtype),
        in_specs=[
            pl.BlockSpec(memory_space=pltpu.MemorySpace.VMEM),
            pl.BlockSpec(memory_space=pltpu.MemorySpace.VMEM),
            pl.BlockSpec(memory_space=pltpu.MemorySpace.VMEM),
        ],
        out_specs=pl.BlockSpec(memory_space=pltpu.MemorySpace.VMEM),
        cost_estimate=cost,
    )(x, w_t, b2d)


if __name__ == "__main__":
    key = jax.random.PRNGKey(0)
    k_x, k_w, k_b = jax.random.split(key, 3)

    B, IN, OUT = 8, 10, 20
    x = jax.random.normal(k_x, (B, IN), dtype=jnp.float32)
    # Deterministic parameter init (mimics nn.Linear uniform(-1/sqrt(in), 1/sqrt(in)))
    bound = 1.0 / (IN ** 0.5)
    weight = jax.random.uniform(k_w, (OUT, IN), minval=-bound, maxval=bound,
                                dtype=jnp.float32)
    bias = jax.random.uniform(k_b, (OUT,), minval=-bound, maxval=bound,
                              dtype=jnp.float32)

    out = linear_pallas(x, weight, bias)
    jax.block_until_ready(out)

    # Reference check against plain JAX
    ref = x @ weight.T + bias
    assert out.shape == (B, OUT)
    assert jnp.allclose(out, ref, atol=1e-5, rtol=1e-5)
    print("KERNEL_OK")
</pallas_src>

<mosaic_0001>
module attributes {stable_mosaic.version = 11 : i64} {
  func.func @_linear_kernel(%arg0: memref<8x10xf32, #tpu.memory_space<vmem>>, %arg1: memref<10x20xf32, #tpu.memory_space<vmem>>, %arg2: memref<1x20xf32, #tpu.memory_space<vmem>>, %arg3: memref<8x20xf32, #tpu.memory_space<vmem>>) attributes {dimension_semantics = [], scalar_prefetch = 0 : i64, scratch_operands = 0 : i64, tpu.core_type = #tpu.core_type<tc>} {
    %c0 = arith.constant 0 : index
    %c0_0 = arith.constant 0 : index
    %0 = vector.load %arg0[%c0, %c0_0] : memref<8x10xf32, #tpu.memory_space<vmem>>, vector<8x10xf32>
    %c0_1 = arith.constant 0 : index
    %c0_2 = arith.constant 0 : index
    %1 = vector.load %arg1[%c0_1, %c0_2] : memref<10x20xf32, #tpu.memory_space<vmem>>, vector<10x20xf32>
    %cst = arith.constant dense<0.000000e+00> : vector<8x20xf32>
    %2 = tpu.matmul %0, %1, %cst {dimension_numbers = #tpu.dot_dimension_numbers<[1], [0], [0], [1], [0, 0, 1, 1], [], []>} : vector<8x10xf32>, vector<10x20xf32>, vector<8x20xf32> -> vector<8x20xf32>
    %c0_3 = arith.constant 0 : index
    %c0_4 = arith.constant 0 : index
    %3 = vector.load %arg2[%c0_3, %c0_4] : memref<1x20xf32, #tpu.memory_space<vmem>>, vector<1x20xf32>
    %4 = vector.broadcast %3 : vector<1x20xf32> to vector<8x20xf32>
    %5 = arith.addf %2, %4 : vector<8x20xf32>
    %c0_5 = arith.constant 0 : index
    %c0_6 = arith.constant 0 : index
    %6 = vector.load %arg3[%c0_5, %c0_6] : memref<8x20xf32, #tpu.memory_space<vmem>>, vector<8x20xf32>
    tpu.vector_store %arg3[%c0_5, %c0_6], %5 {strides = array<i32>} : memref<8x20xf32, #tpu.memory_space<vmem>>, vector<8x20xf32>,
    return
  }
}

</mosaic_0001>

<bundles_post_ra>
// kernel: tpu_custom_call.1
= control target key start
LH: loop header
LB: loop body
LE: loop exit
PB: predicated region body
PF: predicated region fallthrough
CT: control target
= control target key end

     0   :  { %8 = vsyncpa [#allocation3], 0  ;;  %s320_s0 = inlined_call_operand.hbm [shape: f32[8,10], index: 0, kind: input, shape index: {}]   ;;  %s321_s1 = inlined_call_operand.hbm [shape: f32[10,20], index: 1, kind: input, shape index: {}]   ;;  %s322_s2 = inlined_call_operand.vmem [shape: f32[1,20], index: 2, kind: input, shape index: {}]   ;;  %s323_s3 = inlined_call_operand.hbm [shape: f32[8,20], index: 3, kind: output, shape index: {}]  }
   0x1   :  { %9 = vsyncpa [#allocation6], 0 }
   0x2   :  { %10 = vsyncpa [#allocation4], 0  ;;  %s245_s12 = smov [#allocation2]   ;;  %s246_s14 = smov [#allocation5]  }
   0x3   :  { %s17_s13 = sshll.u32 %s245_s12, 4  ;;  %s26_s15 = sshll.u32 %s246_s14, 4  ;;  %s18_s13 = int_to_ptr.vmem [resolvable:$true] %s17_s13  ;;  %s274_s15 = int_to_ptr.vmem [resolvable:$true] %s26_s15 }
   0x4   :  { %s173_s18 = scalar_lea.hbm %s320_s0, 128 }
   0x5   :  { %p174_p0 = scmp.ne.s32.totalorder %s320_s0, %s173_s18  ;;  %p177_p1 = scmp.lt.u32.totalorder %s173_s18, %s320_s0 }
   0x7   :  { %p179_p2 = pnand %p177_p1, %p174_p0 }
   0x9   :  { %182 = shalt.err (!%p179_p2)
}
   0xa   :  { %s183_s23 = scalar_lea.vmem %s18_s13, 128  ;;  %p188_p4 = scmp.lt.s32.totalorder %s18_s13, %s18_s13 }
   0xb   :  { %p184_p3 = scmp.ne.s32.totalorder %s18_s13, %s183_s23  ;;  %p189_p5 = scmp.lt.s32.totalorder %s183_s23, %s183_s23 }
   0xd   :  { %p190_p6 = por %p189_p5, %p188_p4 }
   0xf   :  { %p191_p7 = pnand %p190_p6, %p184_p3 }
  0x11   :  { %194 = shalt.err (!%p191_p7)
}
  0x12   :  { %20 = dma.hbm_to_vmem [thread:$0]  %s320_s0, 128, %s18_s13, [#allocation3]  }
  0x13   :  { %s195_s28 = scalar_lea.hbm %s321_s1, 256 }
  0x14   :  { %p196_p8 = scmp.ne.s32.totalorder %s321_s1, %s195_s28  ;;  %p199_p9 = scmp.lt.u32.totalorder %s195_s28, %s321_s1 }
  0x16   :  { %p201_p10 = pnand %p199_p9, %p196_p8 }
  0x18   :  { %204 = shalt.err (!%p201_p10)
}
  0x19   :  { %s205_s6 = scalar_lea.vmem %s274_s15, 256  ;;  %p210_p12 = scmp.lt.s32.totalorder %s274_s15, %s274_s15 }
  0x1a   :  { %p206_p11 = scmp.ne.s32.totalorder %s274_s15, %s205_s6  ;;  %p211_p13 = scmp.lt.s32.totalorder %s205_s6, %s205_s6 }
  0x1c   :  { %p212_p0 = por %p211_p13, %p210_p12 }
  0x1e   :  { %p213_p1 = pnand %p212_p0, %p206_p11 }
  0x20   :  { %216 = shalt.err (!%p213_p1)
}
  0x21   :  { %s247_s0 = smov 128   ;;  %s248_s7 = smov 8  }
  0x22   :  { %32 = dma.hbm_to_vmem [thread:$0]  %s321_s1, 256, %s274_s15, [#allocation6], %s247_s0, %s247_s0, %s248_s7  }
  0x23   :  { %239 = dma.done.wait [#allocation3], 128  }
  0x24   :  { %240 = vsyncadd [#allocation3], 4294967168 }
  0x25   :  { %241 = dma.done.wait [#allocation6], 256  }
  0x26   :  { %242 = vsyncadd [#allocation6], 4294967040  ;;  %v249_v0 = vmov 0.0|0.0   ;;  %vm250_vm0 = vmmov 0   ;;  %v251_v1 = vmov 0.0   ;;  %vm55_vm1 = vcmask 1041408  }
  0x27   :  { %160 = vmatprep.subr.bf16.mxu0 %v249_v0  ;;  %157 = vmatprep.mubr.msk.f32.mxu0 %vm250_vm0, %v251_v1  ;;  %v42_v2 = vld [vmem:[#allocation5] sm:$0xff]  ;;  %v43_v3 = vld [vmem:[#allocation5 + $0x8] sm:$0x3]  ;;  %vm252_vm2 = vmmov 1   ;;  %v41_v5 = vld [vmem:[#allocation2] sm:$0xff]  ;;  %vm51_vm4 = vcmask 80896  }
  0x28   :  { %vm162_vm3 = vmpackc.low %vm55_vm1, %vm252_vm2  ;;  %v161_v4 = vpack.c.bf16 %v43_v3, %v42_v2  ;;  %v147_v6 = vld [vmem:[%s322_s2] ss:$0 sm:$0xff]  ;;  %s253_s11 = smov [#allocation7]   ;;  %vm129_vm5 = vcmask 162816  }
  0x29   :  { %s137_s12 = sshll.u32 %s253_s11, 4  ;;  %s138_s12 = int_to_ptr.vmem [resolvable:$true] %s137_s12 }
  0x2a   :  { %163 = vmatpush3.bf16.msk.msra.mxu0 %vm162_vm3, %v161_v4  ;;  %s217_s13 = scalar_lea.vmem %s138_s12, 128  ;;  %p222_p3 = scmp.lt.s32.totalorder %s138_s12, %s138_s12 }
  0x2b   :  { %p218_p2 = scmp.ne.s32.totalorder %s138_s12, %s217_s13  ;;  %p223_p4 = scmp.lt.s32.totalorder %s217_s13, %s217_s13 }
  0x2d   :  { %158 = vmatmul.mubr.msk.f32.vlgmr.msra.gmra.mrb[0].mxu0 %vm51_vm4, %v41_v5  ;;  %p224_p5 = por %p223_p4, %p222_p3 }
  0x2f   :  { %p225_p6 = pnand %p224_p5, %p218_p2 }
 0x100   :  { %v125_v7 = vpop.f32.mrb[0].mxu0 }
 0x101   :  { %v126_v8 = vadd.f32 %v147_v6, %v125_v7  ;;  %v159_v9 = vpop.f32.mrb[1].mxu0 }
 0x103   :  { %130 = vst.msk [vmem:[#allocation7] sm:$0xff] %vm129_vm5, %v126_v8 }
 0x104   :  { %228 = shalt.err (!%p225_p6)
}
 0x105   :  { %s229_s16 = scalar_lea.hbm %s323_s3, 128 }
 0x106   :  { %p230_p7 = scmp.ne.s32.totalorder %s323_s3, %s229_s16  ;;  %p233_p8 = scmp.lt.u32.totalorder %s229_s16, %s323_s3 }
 0x108   :  { %p235_p9 = pnand %p233_p8, %p230_p7 }
 0x10a   :  { %238 = shalt.err (!%p235_p9)
}
 0x10b   :  { %140 = dma.vmem_to_hbm [thread:$0]  %s138_s12, 128, %s323_s3, [#allocation4]  }
 0x10c   :  { %243 = dma.done.wait [#allocation4], 128  }
 0x10d   :  { %244 = vsyncadd [#allocation4], 4294967168 }
 0x10e   :  { %144 = vsyncpa [#allocation3], 1 }
 0x10f   :  { %145 = vsyncpa [#allocation6], 1 }
 0x110   :  { %146 = vsyncpa [#allocation4], 1 }

</bundles_post_ra>
